<compile_context>
chip_gen: v5e
topology: v5e:2x2
jax: 0.10.0
libtpu: 0.0.40
codegen_flags: <defaults>
</compile_context>

<pallas_src>
import math

import jax
import jax.numpy as jnp
from jax.experimental import pallas as pl
from jax.experimental.pallas import tpu as pltpu


def _upsample_kernel(x_ref, w_ref, b_ref, o_ref):
    """One grid step: TH image rows of one batch element.

    x_ref : (1, TH*W, Cin)        input tokens (row-major over the TH x W tile)
    w_ref : (Cin, s*s*Cout)       fused weight, columns ordered (kh, kw, oc)
    b_ref : (1, s*s*Cout)         f32 bias tiled over (kh, kw)
    o_ref : (1, TH, s, W, s*Cout) output block already in final raster layout
    """
    _, th, s, w_img, n_kh = o_ref.shape

    x = x_ref[0]                                   # (TH*W, Cin)
    # Single fused MXU matmul (N = s*s*Cout), f32 accumulation.
    y = jnp.dot(x, w_ref[...], preferred_element_type=jnp.float32)
    y = (y + b_ref[...]).astype(o_ref.dtype)       # (TH*W, s*s*Cout)

    # Rasterize: one full-width store per output-row phase kh.  s is tiny
    # (2 or 4) so the loop is statically unrolled.  The reshape only splits
    # the sublane-major token dim (TH*W) into (TH, W) -> tile-preserving, no
    # relayout and no scratch bounce.
    for kh in range(s):
        blk = y[:, kh * n_kh:(kh + 1) * n_kh]      # (TH*W, s*Cout), cols (kw, oc)
        o_ref[0, :, kh, :, :] = blk.reshape(th, w_img, n_kh)


def _round_up(n, m):
    return (n + m - 1) // m * m


def _pick_block_rows(H, W, B, row_bytes, sublane, target_bytes):
    """Largest divisor of H whose tile fits target_bytes, keeps the token dim
    a multiple of the sublane packing (or covers all of H), and -- when
    possible -- yields an even (>= 2) number of parallel grid steps so the
    v7x megacore can shard them evenly."""
    valid = [t for t in range(1, H + 1)
             if H % t == 0 and ((t * W) % sublane == 0 or t == H)]
    fitting = [t for t in valid if t * row_bytes <= target_bytes] or [min(valid)]
    even = [t for t in fitting if (B * (H // t)) >= 2 and (B * (H // t)) % 2 == 0]
    pool = even if even else fitting
    return max(pool)


def upsample_forward(x, weight, bias, upscale, *, block_rows=None,
                     compute_dtype=None):
    """ConvTranspose2d(Cin, Cout, k=s, stride=s) applied to (B, L, Cin) tokens.

    Returns (B, L*s*s, Cout) tokens in the same raster order as the PyTorch
    module (deconv -> flatten(2) -> transpose(1, 2)).

    compute_dtype=jnp.bfloat16 halves HBM read bytes (f32 MXU accumulation is
    kept); recommended when downstream tolerates bf16-rounded inputs/weights.
    """
    B, L, Cin = x.shape
    H = int(round(math.sqrt(L)))
    assert H * H == L, f"Upsample expects a square token grid, got L={L}"
    W = H
    s = int(upscale)
    Cout = weight.shape[1]
    n_kh = s * Cout                    # raster-store columns per kh: (kw, oc)
    n_tot = s * s * Cout               # fused matmul columns: (kh, kw, oc)
    out_dtype = x.dtype

    # PyTorch ConvTranspose2d weight (Cin, Cout, kh, kw)
    #   -> (Cin, kh, kw, Cout) -> (Cin, s*s*Cout); bias tiled over (kh, kw).
    w2d = jnp.transpose(weight, (0, 2, 3, 1)).reshape(Cin, n_tot)
    b2d = jnp.tile(bias.astype(jnp.float32), (s * s,)).reshape(1, n_tot)

    x_c = x
    if compute_dtype is not None:      # bf16 HBM reads, f32 MXU accumulation
        x_c = x.astype(compute_dtype)
        w2d = w2d.astype(compute_dtype)

    x_itemsize = jnp.dtype(x_c.dtype).itemsize
    out_itemsize = jnp.dtype(out_dtype).itemsize
    sublane_in = 8 * max(1, 4 // x_itemsize)     # 8 rows (f32), 16 (bf16)
    sublane_out = 8 * max(1, 4 // out_itemsize)

    # VMEM budget: 75% of physical per-core capacity (v7x: 64 MiB -> 48 MiB;
    # v5e/v6e: 128 MiB -> 96 MiB).  Fall back conservatively if the query is
    # unavailable.
    try:
        vmem_cap = int(pltpu.get_tpu_info().vmem_capacity_bytes)
    except Exception:
        vmem_cap = 64 * 1024 * 1024
    vmem_budget = int(0.75 * vmem_cap)

    # Padded per-image-row VMEM bytes (one input row + one rasterized output
    # row), used to size the tile.
    in_row = W * _round_up(Cin, 128) * x_itemsize
    out_row = s * _round_up(W, sublane_out) * _round_up(n_kh, 128) * out_itemsize
    row_bytes = in_row + out_row
    target_bytes = min(8 << 20, max(1 << 20, vmem_budget // 5))

    if block_rows is None:
        block_rows = _pick_block_rows(H, W, B, row_bytes, sublane_in,
                                      target_bytes)
    TH = int(block_rows)
    assert H % TH == 0, f"block_rows={TH} must divide H={H}"
    assert (TH * W) % sublane_in == 0 or TH == H

    # Per-step VMEM: double-buffered x / out blocks + (double-buffered)
    # resident weight & bias, with lane/sublane padding accounted for.
    x_block = _round_up(TH * W, sublane_in) * _round_up(Cin, 128) * x_itemsize
    out_block = (TH * s * _round_up(W, sublane_out)
                 * _round_up(n_kh, 128) * out_itemsize)
    w_bytes = _round_up(Cin, sublane_in) * _round_up(n_tot, 128) * x_itemsize
    b_bytes = 8 * 128 * 4
    vmem_need = 2 * (x_block + out_block) + 2 * (w_bytes + b_bytes)
    vmem_limit = int(min(vmem_budget,
                         max(int(1.25 * vmem_need), 16 * 1024 * 1024)))

    y = pl.pallas_call(
        _upsample_kernel,
        out_shape=jax.ShapeDtypeStruct((B, H, s, W, n_kh), out_dtype),
        grid=(B, H // TH),
        in_specs=[
            pl.BlockSpec((1, TH * W, Cin), lambda b, h: (b, h, 0)),
            pl.BlockSpec((Cin, n_tot), lambda b, h: (0, 0)),
            pl.BlockSpec((1, n_tot), lambda b, h: (0, 0)),
        ],
        out_specs=pl.BlockSpec((1, TH, s, W, n_kh),
                               lambda b, h: (b, h, 0, 0, 0)),
        compiler_params=pltpu.CompilerParams(
            dimension_semantics=("parallel", "parallel"),
            vmem_limit_bytes=vmem_limit),
    )(x_c, w2d, b2d)

    # (B, H, s, W, s*Cout) already holds raster order (h, kh, w, kw, oc);
    # flattening to tokens is a contiguous (free) reshape — no HBM shuffle.
    return y.reshape(B, H * s * W * s, Cout)


def _reference(x, weight, bias, s):
    # Independent pure-JAX reference of the same ConvTranspose2d semantics.
    B, L, Cin = x.shape
    H = int(round(math.sqrt(L)))
    W = H
    Cout = weight.shape[1]
    xi = x.reshape(B, H, W, Cin)
    y = jnp.einsum("bhwi,iokl->bhkwlo", xi, weight) + bias
    return y.reshape(B, H * s * W * s, Cout)


if __name__ == "__main__":
    B = 2
    in_channel = 4
    out_channel = 8
    upscale = 2
    H = W = 16
    L = H * W

    key = jax.random.PRNGKey(0)
    kx, kw_, kb = jax.random.split(key, 3)

    x = jax.random.normal(kx, (B, L, in_channel), dtype=jnp.float32)

    # Deterministic ConvTranspose2d params (PyTorch shapes: weight
    # (Cin, Cout, k, k), bias (Cout,)), kaiming-uniform-style bound.
    fan_in = in_channel * upscale * upscale
    bound = 1.0 / math.sqrt(fan_in)
    weight = jax.random.uniform(
        kw_, (in_channel, out_channel, upscale, upscale),
        minval=-bound, maxval=bound, dtype=jnp.float32)
    bias = jax.random.uniform(
        kb, (out_channel,), minval=-bound, maxval=bound, dtype=jnp.float32)

    ref = _reference(x, weight, bias, upscale)

    # f32 path; block_rows=4 -> grid (B, H//4) = (2, 4) exercises row tiling.
    out = upsample_forward(x, weight, bias, upscale, block_rows=4)
    out = jax.block_until_ready(out)
    assert out.shape == (B, L * upscale * upscale, out_channel), out.shape
    assert jnp.allclose(out, ref, atol=1e-5, rtol=1e-5), "f32 mismatch vs reference"

    # bf16-input path (f32 accumulation), auto (megacore-friendly) tile choice.
    out_bf16 = upsample_forward(x, weight, bias, upscale,
                                compute_dtype=jnp.bfloat16)
    out_bf16 = jax.block_until_ready(out_bf16)
    assert out_bf16.shape == out.shape
    assert jnp.allclose(out_bf16, ref, atol=5e-2, rtol=5e-2), "bf16 mismatch vs reference"

    print("KERNEL_OK")
</pallas_src>

<mosaic_0001>
module attributes {stable_mosaic.version = 11 : i64} {
  func.func @_upsample_kernel(%arg0: i32, %arg1: i32, %arg2: memref<1x64x4xf32, #tpu.memory_space<vmem>>, %arg3: memref<4x32xf32, #tpu.memory_space<vmem>>, %arg4: memref<1x32xf32, #tpu.memory_space<vmem>>, %arg5: memref<1x4x2x16x16xf32, #tpu.memory_space<vmem>>) attributes {dimension_semantics = [#tpu.dimension_semantics<parallel>, #tpu.dimension_semantics<parallel>], iteration_bounds = array<i64: 2, 4>, scalar_prefetch = 0 : i64, scratch_operands = 0 : i64, tpu.core_type = #tpu.core_type<tc>, window_params = [{transform_indices = @transform_0, window_bounds = array<i64: 1, 64, 4>}, {pipeline_mode = #tpu.pipeline_mode<synchronous>, transform_indices = @transform_1, window_bounds = array<i64: 4, 32>}, {pipeline_mode = #tpu.pipeline_mode<synchronous>, transform_indices = @transform_2, window_bounds = array<i64: 1, 32>}, {transform_indices = @transform_3, window_bounds = array<i64: 1, 4, 2, 16, 16>}]} {
    %c0 = arith.constant 0 : index
    %c0_0 = arith.constant 0 : index
    %c0_1 = arith.constant 0 : index
    %0 = vector.load %arg2[%c0, %c0_0, %c0_1] : memref<1x64x4xf32, #tpu.memory_space<vmem>>, vector<1x64x4xf32>
    %1 = vector.shape_cast %0 : vector<1x64x4xf32> to vector<64x4xf32>
    %c0_2 = arith.constant 0 : index
    %c0_3 = arith.constant 0 : index
    %2 = vector.load %arg3[%c0_2, %c0_3] : memref<4x32xf32, #tpu.memory_space<vmem>>, vector<4x32xf32>
    %cst = arith.constant dense<0.000000e+00> : vector<64x32xf32>
    %3 = tpu.matmul %1, %2, %cst {dimension_numbers = #tpu.dot_dimension_numbers<[1], [0], [0], [1], [0, 0, 1, 1], [], []>} : vector<64x4xf32>, vector<4x32xf32>, vector<64x32xf32> -> vector<64x32xf32>
    %c0_4 = arith.constant 0 : index
    %c0_5 = arith.constant 0 : index
    %4 = vector.load %arg4[%c0_4, %c0_5] : memref<1x32xf32, #tpu.memory_space<vmem>>, vector<1x32xf32>
    %5 = vector.broadcast %4 : vector<1x32xf32> to vector<64x32xf32>
    %6 = arith.addf %3, %5 : vector<64x32xf32>
    %7 = vector.extract_strided_slice %6 {offsets = [0, 0], sizes = [64, 16], strides = [1, 1]} : vector<64x32xf32> to vector<64x16xf32>
    %8 = vector.shape_cast %7 : vector<64x16xf32> to vector<4x16x16xf32>
    %c0_6 = arith.constant 0 : index
    %c0_7 = arith.constant 0 : index
    %c0_8 = arith.constant 0 : index
    %c0_9 = arith.constant 0 : index
    %c0_10 = arith.constant 0 : index
    %9 = vector.load %arg5[%c0_6, %c0_7, %c0_8, %c0_9, %c0_10] : memref<1x4x2x16x16xf32, #tpu.memory_space<vmem>>, vector<1x4x1x16x16xf32>
    %10 = vector.shape_cast %9 : vector<1x4x1x16x16xf32> to vector<4x16x16xf32>
    %11 = vector.shape_cast %8 : vector<4x16x16xf32> to vector<1x4x1x16x16xf32>
    tpu.vector_store %arg5[%c0_6, %c0_7, %c0_8, %c0_9, %c0_10], %11 {strides = array<i32>} : memref<1x4x2x16x16xf32, #tpu.memory_space<vmem>>, vector<1x4x1x16x16xf32>,
    %12 = vector.extract_strided_slice %6 {offsets = [0, 16], sizes = [64, 16], strides = [1, 1]} : vector<64x32xf32> to vector<64x16xf32>
    %13 = vector.shape_cast %12 : vector<64x16xf32> to vector<4x16x16xf32>
    %c0_11 = arith.constant 0 : index
    %c0_12 = arith.constant 0 : index
    %c1 = arith.constant 1 : index
    %c0_13 = arith.constant 0 : index
    %c0_14 = arith.constant 0 : index
    %14 = vector.load %arg5[%c0_11, %c0_12, %c1, %c0_13, %c0_14] : memref<1x4x2x16x16xf32, #tpu.memory_space<vmem>>, vector<1x4x1x16x16xf32>
    %15 = vector.shape_cast %14 : vector<1x4x1x16x16xf32> to vector<4x16x16xf32>
    %16 = vector.shape_cast %13 : vector<4x16x16xf32> to vector<1x4x1x16x16xf32>
    tpu.vector_store %arg5[%c0_11, %c0_12, %c1, %c0_13, %c0_14], %16 {strides = array<i32>} : memref<1x4x2x16x16xf32, #tpu.memory_space<vmem>>, vector<1x4x1x16x16xf32>,
    return
  }
  func.func @transform_0(%arg0: i32, %arg1: i32) -> (i32, i32, i32) {
    %c0_i32 = arith.constant 0 : i32
    %c0_i32_0 = arith.constant 0 : i32
    return %arg0, %arg1, %c0_i32 : i32, i32, i32
  }
  func.func @transform_1(%arg0: i32, %arg1: i32) -> (i32, i32) {
    %c0_i32 = arith.constant 0 : i32
    %c0_i32_0 = arith.constant 0 : i32
    %c0_i32_1 = arith.constant 0 : i32
    return %c0_i32, %c0_i32_0 : i32, i32
  }
  func.func @transform_2(%arg0: i32, %arg1: i32) -> (i32, i32) {
    %c0_i32 = arith.constant 0 : i32
    %c0_i32_0 = arith.constant 0 : i32
    %c0_i32_1 = arith.constant 0 : i32
    return %c0_i32, %c0_i32_0 : i32, i32
  }
  func.func @transform_3(%arg0: i32, %arg1: i32) -> (i32, i32, i32, i32, i32) {
    %c0_i32 = arith.constant 0 : i32
    %c0_i32_0 = arith.constant 0 : i32
    %c0_i32_1 = arith.constant 0 : i32
    %c0_i32_2 = arith.constant 0 : i32
    return %arg0, %arg1, %c0_i32, %c0_i32_0, %c0_i32_1 : i32, i32, i32, i32, i32
  }
}

</mosaic_0001>

<bundles_post_ra>
// kernel: tpu_custom_call.1
= control target key start
LH: loop header
LB: loop body
LE: loop exit
PB: predicated region body
PF: predicated region fallthrough
CT: control target
= control target key end

     0   :  { %8 = vsyncpa [#allocation3], 0  ;;  %s839_s0 = inlined_call_operand.vmem [shape: f32[2,256,4], index: 0, kind: input, shape index: {}]   ;;  %s840_s1 = inlined_call_operand.vmem [shape: f32[4,32], index: 1, kind: input, shape index: {}]   ;;  %s841_s2 = inlined_call_operand.vmem [shape: f32[1,32], index: 2, kind: input, shape index: {}]   ;;  %s842_s3 = inlined_call_operand.hbm [shape: f32[2,16,2,16,16], index: 3, kind: output, shape index: {}]  }
   0x1   :  { %10 = vsyncpa [#allocation3 + $0x1], 0  ;;  %s665_s12 = smov 0   ;;  %s667_s13 = smov 0  }
   0x2   :  { %s669_s14 = smov 0   ;;  %s671_s15 = smov 0  }
   0x3   :  { %s673_s16 = smov 0   ;;  %s675_s17 = smov 0  }
   0x4   :  { %s677_s18 = smov 0   ;;  %s679_s19 = smov 0  }
   0x5 LB: > { %s434_s20 = sadd.s32 4294967295, %s640_s19   ;;  %s435_s21 = sadd.s32 4294967294, %s640_s19   ;;  %s640_s19 = sphi %s679_s19, %s16_s19   ;;  %s636_s18 = sphi %s677_s18, %s851_s18   ;;  %s632_s17 = sphi %s675_s17, %s850_s17   ;;  %s628_s16 = sphi %s673_s16, %s849_s16   ;;  %s624_s15 = sphi %s671_s15, %s848_s15   ;;  %s620_s14 = sphi %s669_s14, %s847_s14   ;;  %s616_s13 = sphi %s667_s13, %s846_s13   ;;  %s612_s12 = sphi %s665_s12, %s845_s12  }
   0x6   : > { %s25_s22 = sadd.s32 1, %s632_s17  ;;  %s28_s23 = sadd.s32 1, %s636_s18 }
   0x7   : > { %p26_p0 = scmp.ge.s32.totalorder %s25_s22, 4  ;;  %p117_p1 = scmp.ne.s32.totalorder %s620_s14, %s616_s13 }
   0x8   : > { %p118_p2 = scmp.eq.s32.totalorder %s434_s20, 7  ;;  %p123_p5 = scmp.ne.s32.totalorder %s616_s13, %s612_s12 }
   0x9   : > { %s853_s22 = smov (%p26_p0, %s25_s22), 0  ;;  %s855_s23 = smov (!%p26_p0, %s28_s23), %s636_s18 }
   0xa   : > { %s103_s24 = ssub.s32 %s632_s17, %s853_s22  ;;  %p716_p3 = por %p118_p2, %p117_p1 }
   0xb   : > { %p30_p4 = scmp.ge.s32.totalorder %s855_s23, 2  ;;  %p124_p6 = scmp.eq.s32.totalorder %s435_s21, 7 }
   0xc   : > { %p438_p7 = scmp.ge.s32.totalorder %s640_s19, 1  ;;  %p161_p9 = scmp.lt.s32.totalorder %s640_s19, 9 }
   0xd   : > { %s857_s23 = smov (%p30_p4, %s855_s23), 0  ;;  %p725_p8 = por %p124_p6, %p123_p5 }
   0xe   : > { %s102_s27 = ssub.s32 %s636_s18, %s857_s23  ;;  %s107_s28 = sadd.s32 1, %s620_s14 }
   0xf   : > { %s104_s29 = sor.u32 %s103_s24, %s102_s27  ;;  %p162_p10 = pnand %p438_p7, %p161_p9 }
  0x10   : > { %p105_p11 = scmp.eq.s32.totalorder %s104_s29, 0  ;;  %s440_s6 = sshll.u32 (!%p162_p10), %s624_s15, 3 }
  0x11   : > { %165 = sbr.rel (%p162_p10) target bundleno = 293 (0x125), region = 32  ;;  %p190_p12 = scmp.lt.s32.totalorder (!%p162_p10), %s628_s16, 1 }
  0x12   : > { %s734_s30 = scalar_select %p105_p11, %s620_s14, %s107_s28  }
  0x13   : > { %p192_p13 = scmp.lt.s32.totalorder (!%p162_p10), %s440_s6, 31  ;;  %s186_s24 = sand.u32 (!%p162_p10), 1, %s616_s13  }
  0x14   : > { %s439_s27 = sshll.u32 (!%p162_p10), %s186_s24, 7  ;;  %s642_s5 = smov (!%p162_p10), 112  }
  0x15   : > { %s759_s4 = scalar_lea.vmem (!%p162_p10), [#allocation2], %s439_s27 }
  0x16   : > { %v208_v0 = vld [vmem:[%s840_s1] sm:$0xf]  ;;  %vm238_vm0 = vcmask 1043456   ;;  %s191_s7 = scalar_select %p190_p12, %s628_s16, 1  ;;  %vm213_vm1 = vcmask 31744   ;;  %vm283_vm2 = vcmask 130048  }
  0x17   : > { %443 = vmatpush.msk.msra.mxu0 %vm238_vm0, %v208_v0  ;;  %468 = vmatpush.msk.msra.mxu1 %vm238_vm0, %v208_v0  ;;  %s859_s6 = smov (!%p192_p13, %s440_s6), 31  ;;  %v545_v9 = vld [vmem:[%s841_s2] ss:$0 sm:$0xff] }
  0x18   : > { %470 = vmatpush.msk.msra.mxu3 %vm238_vm0, %v208_v0  ;;  %469 = vmatpush.msk.msra.mxu2 %vm238_vm0, %v208_v0  ;;  %s441_s8 = sshll.u32 %s191_s7, 5  ;;  %s463_s7 = sshll.u32 %s628_s16, 6 }
  0x19   : > { %s195_s9 = sadd.s32 %s441_s8, %s859_s6  ;;  %s467_s6 = sshll.u32 %s624_s15, 4 }
  0x1a   : > { %s442_s10 = sshll.u32 %s195_s9, 3  ;;  %s346_s8 = sadd.s32 %s467_s6, %s463_s7 }
  0x1b   : > { %s197_s21 = scalar_lea.vmem %s839_s0, %s442_s10  ;;  %s464_s9 = sshll.u32 %s346_s8, 3 }
  0x1c   : > { %v200_v1 = vld [vmem:[%s197_s21] sm:$0xff]  ;;  %v202_v2 = vld [vmem:[%s197_s21 + $0x10] sm:$0xff]  ;;  %v201_v5 = vld [vmem:[%s197_s21 + $0x8] sm:$0xff]  ;;  %s348_s20 = scalar_lea.hbm %s842_s3, %s464_s9  ;;  %s349_s15 = sshll.u32 %s759_s4, 4  ;;  %s350_s15 = int_to_ptr.vmem [resolvable:$true] %s349_s15 }
  0x1d   : > { %v206_v3 = vld [vmem:[%s197_s21 + $0x30] sm:$0xff]  ;;  %444 = vmatmul.msk.f32.vlgmr.msra.gmra.mxu0 %vm213_vm1, %v200_v1  ;;  %446 = vmatmul.msk.f32.vlgmr.msra.gmra.mxu1 %vm213_vm1, %v202_v2  ;;  %v204_v4 = vld [vmem:[%s197_s21 + $0x20] sm:$0xff]  ;;  %v203_v6 = vld [vmem:[%s197_s21 + $0x18] sm:$0xff]  ;;  %s351_s16 = sshll.u32 %s348_s20, 4  ;;  %s566_s6 = scalar_lea.hbm %s842_s3, 1024  ;;  %s352_s16 = int_to_ptr.hbm [resolvable:$true] %s351_s16 }
  0x1e   : > { %450 = vmatmul.msk.f32.vlgmr.msra.gmra.mxu3 %vm213_vm1, %v206_v3  ;;  %448 = vmatmul.msk.f32.vlgmr.msra.gmra.mxu2 %vm213_vm1, %v204_v4  ;;  %v207_v7 = vld [vmem:[%s197_s21 + $0x38] sm:$0xff]  ;;  %v205_v8 = vld [vmem:[%s197_s21 + $0x28] sm:$0xff]  ;;  %s334_s21 = scalar_lea.sflag [#allocation3], %s186_s24  ;;  %s560_s27 = sshra.s32 %s352_s16, 4  ;;  %s561_s27 = int_to_ptr.hbm [resolvable:$true] %s560_s27 }
  0x1f   : > { %s562_s28 = scalar_lea.hbm %s561_s27, 128  ;;  %p567_p4 = scmp.lt.s32.totalorder %s561_s27, %s842_s3 }
  0x20   : > { %p563_p0 = scmp.ne.s32.totalorder %s561_s27, %s562_s28  ;;  %p568_p5 = scmp.lt.s32.totalorder %s566_s6, %s562_s28 }
  0x22   : > { %p564_p1 = pnand %p563_p0, %p716_p3  ;;  %p569_p6 = por %p568_p5, %p567_p4 }
  0x24   : > { %p565_p2 = pneg %p564_p1 }
  0x25   : > { %445 = vmatmul.msk.f32.gmra.mxu0 %vm213_vm1, %v201_v5  ;;  %447 = vmatmul.msk.f32.gmra.mxu1 %vm213_vm1, %v203_v6 }
  0x26   : > { %451 = vmatmul.msk.f32.gmra.mxu3 %vm213_vm1, %v207_v7  ;;  %449 = vmatmul.msk.f32.gmra.mxu2 %vm213_vm1, %v205_v8  ;;  %p570_p7 = pnand %p569_p6, %p565_p2 }
  0x9a   : > { %v259_v10 = vpop.f32.mrf.mxu0  ;;  %v265_v11 = vpop.f32.mrf.mxu1 }
  0x9b   : > { %v260_v12 = vadd.f32 %v545_v9, %v259_v10  ;;  %v266_v13 = vadd.f32 %v545_v9, %v265_v11 }
  0x9d   : > { %284 = vst.msk [vmem:[%s759_s4] sm:$0xff] %vm283_vm2, %v260_v12  ;;  %304 = vrot.lane.b32.xlu1 %v266_v13, %s642_s5  ;;  %300 = vrot.lane.b32.xlu0 %v260_v12, %s642_s5 }
  0x9e   : > { %286 = vst.msk [vmem:[%s759_s4 + $0x20] sm:$0xff] %vm283_vm2, %v266_v13 }
  0xa1   : > { %v277_v14 = vpop.f32.mrf.mxu3  ;;  %v271_v20 = vpop.f32.mrf.mxu2 }
  0xa2   : > { %v262_v15 = vpop.f32.mrf.mxu0  ;;  %v268_v16 = vpop.f32.mrf.mxu1  ;;  %v278_v17 = vadd.f32 %v545_v9, %v277_v14  ;;  %v272_v21 = vadd.f32 %v545_v9, %v271_v20 }
  0xa3   : > { %v263_v18 = vadd.f32 %v545_v9, %v262_v15  ;;  %v269_v19 = vadd.f32 %v545_v9, %v268_v16 }
  0xa4   : > { %290 = vst.msk [vmem:[%s759_s4 + $0x60] sm:$0xff] %vm283_vm2, %v278_v17  ;;  %308 = vrot.lane.b32.xlu2 %v272_v21, %s642_s5 }
  0xa5   : > { %285 = vst.msk [vmem:[%s759_s4 + $0x8] sm:$0xff] %vm283_vm2, %v263_v18  ;;  %306 = vrot.lane.b32.xlu1 %v269_v19, %s642_s5  ;;  %302 = vrot.lane.b32.xlu0 %v263_v18, %s642_s5 }
  0xa6   : > { %287 = vst.msk [vmem:[%s759_s4 + $0x28] sm:$0xff] %vm283_vm2, %v269_v19 }
  0xa7   : > { %288 = vst.msk [vmem:[%s759_s4 + $0x40] sm:$0xff] %vm283_vm2, %v272_v21 }
  0xa9   : > { %v280_v22 = vpop.f32.mrf.mxu3  ;;  %v274_v24 = vpop.f32.mrf.mxu2 }
  0xaa   : > { %v281_v23 = vadd.f32 %v545_v9, %v280_v22  ;;  %v275_v25 = vadd.f32 %v545_v9, %v274_v24 }
  0xac   : > { %291 = vst.msk [vmem:[%s759_s4 + $0x68] sm:$0xff] %vm283_vm2, %v281_v23  ;;  %310 = vrot.lane.b32.xlu2 %v275_v25, %s642_s5 }
  0xad   : > { %314 = vrot.lane.b32.xlu1 %v281_v23, %s642_s5  ;;  %312 = vrot.lane.b32.xlu0 %v278_v17, %s642_s5  ;;  %289 = vst.msk [vmem:[%s759_s4 + $0x48] sm:$0xff] %vm283_vm2, %v275_v25 }
  0xfe   : > { %v309_v26 = vpop.permute.xlu2 %308 }
  0xff   : > { %456 = vst.msk [vmem:[%s759_s4 + $0x50] sm:$0xff] %vm283_vm2, %v309_v26 }
 0x106   : > { %v311_v27 = vpop.permute.xlu2 %310 }
 0x107   : > { %457 = vst.msk [vmem:[%s759_s4 + $0x58] sm:$0xff] %vm283_vm2, %v311_v27 }
 0x10f   : > { %v305_v28 = vpop.permute.xlu1 %304  ;;  %v301_v29 = vpop.permute.xlu0 %300 }
 0x110   : > { %454 = vst.msk [vmem:[%s759_s4 + $0x30] sm:$0xff] %vm283_vm2, %v305_v28 }
 0x111   : > { %452 = vst.msk [vmem:[%s759_s4 + $0x10] sm:$0xff] %vm283_vm2, %v301_v29 }
 0x117   : > { %v307_v30 = vpop.permute.xlu1 %306  ;;  %v303_v31 = vpop.permute.xlu0 %302 }
 0x118   : > { %455 = vst.msk [vmem:[%s759_s4 + $0x38] sm:$0xff] %vm283_vm2, %v307_v30 }
 0x119   : > { %453 = vst.msk [vmem:[%s759_s4 + $0x18] sm:$0xff] %vm283_vm2, %v303_v31 }
 0x11f   : > { %v315_v32 = vpop.permute.xlu1 %314  ;;  %v313_v33 = vpop.permute.xlu0 %312 }
 0x120   : > { %459 = vst.msk [vmem:[%s759_s4 + $0x78] sm:$0xff] %vm283_vm2, %v315_v32 }
 0x121   : > { %458 = vst.msk [vmem:[%s759_s4 + $0x70] sm:$0xff] %vm283_vm2, %v313_v33 }
 0x122   : > { %573 = shalt.err (!%p570_p7)
}
 0x123   : > { %s643_s24 = smov 128   ;;  %s644_s4 = smov 8  }
 0x124   : > { %471 = dma.vmem_to_hbm [thread:$0]  (%p716_p3), %s350_s15, 2048, %s352_s16, %s334_s21, %s643_s24, %s643_s24, %s644_s4  }
 0x125 PF: > { %p477_p9 = scmp.ge.s32.totalorder %s640_s19, 2  ;;  %s366_s9 = sand.u32 1, %s612_s12  }
 0x126   : > { %s367_s10 = scalar_lea.sflag [#allocation3], %s366_s9 }
 0x127   : > { %p474_p10 = pnand %p477_p9, %p725_p8 }
 0x129   : > { %p475_p11 = pneg %p474_p10 }
 0x12b   : > { %607 = dma.done.wait (%p475_p11), %s367_s10, 2048  }
 0x12c   : > { %609 = vsyncadd (%p475_p11), %s367_s10, 4294965248  ;;  %s16_s19 = sadd.s32 1, %s640_s19   ;;  %s845_s12 = smov %s616_s13 }
 0x12d   : > { %p13_p12 = scmp.ge.s32.totalorder %s16_s19, 10   ;;  %s846_s13 = smov %s620_s14 }
 0x12e   : > { %s847_s14 = smov %s734_s30  ;;  %s848_s15 = smov %s632_s17 }
 0x12f   : > { %s849_s16 = smov %s636_s18  ;;  %s850_s17 = smov %s853_s22 }
 0x130   : > { %s851_s18 = smov %s857_s23  ;;  %15 = sbr.rel (!%p13_p12) target bundleno = 5 (0x5), region = 68 }
 0x135   :  { %373 = vsyncpa [#allocation3], 1 }
 0x136   :  { %375 = vsyncpa [#allocation3 + $0x1], 1 }

</bundles_post_ra>
